<compile_context>
chip_gen: v5e
topology: v5e:2x2
jax: 0.10.0
libtpu: 0.0.40
codegen_flags: <defaults>
</compile_context>

<pallas_src>
import functools

import jax
import jax.numpy as jnp
from jax import lax
from jax.experimental import pallas as pl
from jax.experimental.pallas import tpu as pltpu


def _rnn_recurrent_kernel(proj_ref, whh0_ref, wih1_ref, whh1_ref, b1_ref,
                          r_last_ref, hn_ref,
                          h0_sc, h1_sc,
                          *, chunk, win_last, seq_len, num_chunks):
    """Grid axis 0 = time-chunk index (sequential / 'arbitrary').

    proj_ref : (chunk, win_pad, H) f32  hoisted layer-0 projection (+ layer-0 biases)
    whh0_ref : (H, H)              bf16 W_hh0^T
    wih1_ref : (H, H)              bf16 W_ih1^T
    whh1_ref : (H, H)              bf16 W_hh1^T
    b1_ref   : (1, H)              f32  b_ih1 + b_hh1
    r_last_ref: (1, chunk, H)      f32  r_out[t, -1, :] for the chunk's steps
    hn_ref   : (2, win_pad, H)     f32  final (h_n, h_c), written at last chunk
    h0_sc/h1_sc: (win_pad, H)      f32  hidden state, persistent across chunks
    """
    c = pl.program_id(0)

    @pl.when(c == 0)
    def _init():
        h0_sc[...] = jnp.zeros_like(h0_sc)
        h1_sc[...] = jnp.zeros_like(h1_sc)

    win_pad, H = h0_sc.shape
    bf16 = jnp.bfloat16

    # Weights / fused bias loaded once per chunk; bias broadcast hoisted out of
    # the unrolled step loop (JAX does not CSE broadcast_in_dim).
    whh0 = whh0_ref[...]                                 # (H, H)  bf16
    wih1 = wih1_ref[...]                                 # (H, H)  bf16
    whh1 = whh1_ref[...]                                 # (H, H)  bf16
    b1 = jnp.broadcast_to(b1_ref[...], (win_pad, H))     # (win_pad, H) f32

    h0 = h0_sc[...]
    h1 = h1_sc[...]
    h0_bf = h0.astype(bf16)   # hoisted cast, reused by the next step's layer-0 matmul

    # Steps >= tail_valid exist only because the last chunk is padded; their
    # state updates are discarded via a cheap select.  tail_valid is static, so
    # fully-valid steps carry zero guard overhead.
    tail_valid = seq_len - (num_chunks - 1) * chunk
    is_last_chunk = c == num_chunks - 1

    last_rows = []
    # Static unroll of the chunk's time steps: one long straight-line window
    # for the LLO scheduler (tanh/casts hide under the MXU work).
    for s in range(chunk):
        h1_bf = h1.astype(bf16)
        # Layer-1 recurrent half FIRST: depends only on the previous step's h1,
        # so it overlaps the layer-0 matmul/tanh sitting on the critical path.
        part1 = jnp.dot(h1_bf, whh1, preferred_element_type=jnp.float32)
        # Layer 0: hoisted input projection (+ layer-0 biases) + recurrent term.
        pre0 = proj_ref[s] + jnp.dot(h0_bf, whh0, preferred_element_type=jnp.float32)
        h0_new = jnp.tanh(pre0)
        h0_new_bf = h0_new.astype(bf16)
        # Layer 1: the dependent half of the (previously fused) matmul.
        pre1 = part1 + jnp.dot(h0_new_bf, wih1, preferred_element_type=jnp.float32) + b1
        h1_new = jnp.tanh(pre1)

        if s >= tail_valid:
            # Out-of-range steps exist only on the last (partial) chunk; keep
            # the old state there so h_n/h_c reflect the last REAL time step.
            h0_new = jnp.where(is_last_chunk, h0, h0_new)
            h1_new = jnp.where(is_last_chunk, h1, h1_new)

        h0, h1, h0_bf = h0_new, h1_new, h0_new_bf
        last_rows.append(h1[win_last:win_last + 1, :])   # r_out[t, -1, :]

    h0_sc[...] = h0
    h1_sc[...] = h1
    # One unmasked, lane+sublane-dense (chunk, H) store per chunk (chunk % 8 == 0).
    r_last_ref[0, :, :] = jnp.concatenate(last_rows, axis=0)

    @pl.when(c == num_chunks - 1)
    def _finalize():
        hn_ref[0, :, :] = h0
        hn_ref[1, :, :] = h1


@functools.lru_cache(maxsize=None)
def _build_pallas_rnn(seq_len, win_pad, H, chunk, win_last):
    num_chunks = -(-seq_len // chunk)
    kernel = functools.partial(_rnn_recurrent_kernel, chunk=chunk, win_last=win_last,
                               seq_len=seq_len, num_chunks=num_chunks)
    grid_spec = pltpu.PrefetchScalarGridSpec(
        num_scalar_prefetch=0,
        grid=(num_chunks,),                                       # sequential time chunks
        in_specs=[
            pl.BlockSpec((chunk, win_pad, H), lambda c: (c, 0, 0)),  # proj            f32
            pl.BlockSpec((H, H), lambda c: (0, 0)),                  # W_hh0^T         bf16
            pl.BlockSpec((H, H), lambda c: (0, 0)),                  # W_ih1^T         bf16
            pl.BlockSpec((H, H), lambda c: (0, 0)),                  # W_hh1^T         bf16
            pl.BlockSpec((1, H), lambda c: (0, 0)),                  # b_ih1 + b_hh1   f32
        ],
        out_specs=[
            pl.BlockSpec((1, chunk, H), lambda c: (c, 0, 0)),        # r_out[:, -1, :] chunks
            pl.BlockSpec((2, win_pad, H), lambda c: (0, 0, 0)),      # (h_n, h_c) resident
        ],
        scratch_shapes=[
            pltpu.VMEM((win_pad, H), jnp.float32),   # layer-0 hidden state
            pltpu.VMEM((win_pad, H), jnp.float32),   # layer-1 hidden state
        ],
    )
    return pl.pallas_call(
        kernel,
        out_shape=(jax.ShapeDtypeStruct((num_chunks, chunk, H), jnp.float32),
                   jax.ShapeDtypeStruct((2, win_pad, H), jnp.float32)),
        grid_spec=grid_spec,
        compiler_params=pltpu.CompilerParams(dimension_semantics=("arbitrary",)),
    )


def _round_up(x, m):
    return (x + m - 1) // m * m


def _pick_chunk(B, cap=64):
    """Chunk of the sequence (multiple of 8 sublanes) with remainder support.

    Short sequences run as one chunk (no grid overhead).  Longer ones pick the
    multiple-of-8 chunk <= cap that minimizes wasted (padded) tail steps, then
    minimizes the number of grid steps.  No divisor-of-B requirement, so prime
    B no longer degrades to chunk=1.
    """
    b_pad = _round_up(B, 8)
    if b_pad <= cap:
        return b_pad
    best, best_cost = 8, None
    for c in range(8, cap + 1, 8):
        n = -(-B // c)
        waste = n * c - B
        cost = (waste, n)
        if best_cost is None or cost < best_cost:
            best, best_cost = c, cost
    return best


def rnn_model_forward(x5d, params, h_state=None, win=8):
    """Mirrors RNN_Model.forward. `h_state` is accepted and ignored (as in PyTorch)."""
    del h_state
    B = x5d.shape[0]
    H = params["w_hh0"].shape[0]

    # x = input[:, :, :, :, :win].view(B, -1, win).permute([0, 2, 1])
    x = jnp.transpose(x5d[..., :win].reshape(B, -1, win), (0, 2, 1))  # (seq=B, rnn_batch=win, I)
    x = x.astype(jnp.float32)

    # Pad the rnn-batch (win) axis to a multiple of 8 sublanes; padded rows are
    # independent and discarded at the end.
    win_pad = _round_up(win, 8)
    if win_pad != win:
        x = jnp.pad(x, ((0, 0), (0, win_pad - win), (0, 0)))

    # Hoisted layer-0 input projection: one big dependency-free bf16 MXU matmul
    # (runs in XLA, outside the serial recurrence), with layer-0 biases folded in.
    w_ih0_t = params["w_ih0"].T.astype(jnp.bfloat16)                   # (I, H)
    proj = jnp.dot(x.astype(jnp.bfloat16).reshape(B * win_pad, -1), w_ih0_t,
                   preferred_element_type=jnp.float32)
    proj = proj.reshape(B, win_pad, H) + (params["b_ih0"] + params["b_hh0"])[None, None, :]
    proj = proj.astype(jnp.float32)

    # Chunking with remainder: pad the sequence axis of proj to num_chunks*chunk;
    # padded steps never commit state inside the kernel.
    chunk = _pick_chunk(B)
    num_chunks = -(-B // chunk)
    seq_pad = num_chunks * chunk
    if seq_pad != B:
        proj = jnp.pad(proj, ((0, seq_pad - B), (0, 0), (0, 0)))

    # Recurrent weights: bf16, pre-transposed; layer-1 weights kept SEPARATE so
    # the h1_prev @ W_hh1^T half runs off the critical path.  Biases pre-summed.
    w_hh0_t = params["w_hh0"].T.astype(jnp.bfloat16)                   # (H, H)
    w_ih1_t = params["w_ih1"].T.astype(jnp.bfloat16)                   # (H, H)
    w_hh1_t = params["w_hh1"].T.astype(jnp.bfloat16)                   # (H, H)
    b1 = (params["b_ih1"] + params["b_hh1"])[None, :].astype(jnp.float32)

    fwd = _build_pallas_rnn(B, win_pad, H, chunk, win - 1)
    r_last, hn = fwd(proj, w_hh0_t, w_ih1_t, w_hh1_t, b1)

    # readout: (B, H) @ (H, C) + b  -- tiny, done in XLA (keeps the kernel's
    # pipelined outputs lane-dense).
    r_last = r_last.reshape(seq_pad, H)[:B]
    out = jnp.dot(r_last, params["w_ro"].T) + params["b_ro"][None, :]

    # `r_out, (h_n, h_c) = self.rnn(x)` -> h_n = hidden[layer 0], h_c = hidden[layer 1]
    return out, (hn[0, :win, :], hn[1, :win, :])


def _reference_forward(x5d, params, win):
    """Pure-JAX reference: 2-layer tanh RNN (seq-first) + Linear, using the same
    bf16-matmul / f32-accumulate numerics as the kernel."""
    B = x5d.shape[0]
    H = params["w_hh0"].shape[0]
    bf = jnp.bfloat16
    x = jnp.transpose(x5d[..., :win].reshape(B, -1, win), (0, 2, 1)).astype(jnp.float32)

    wih0 = params["w_ih0"].T.astype(bf)
    whh0 = params["w_hh0"].T.astype(bf)
    wih1 = params["w_ih1"].T.astype(bf)
    whh1 = params["w_hh1"].T.astype(bf)
    b0 = params["b_ih0"] + params["b_hh0"]
    b1 = params["b_ih1"] + params["b_hh1"]

    def step(carry, x_t):
        h0, h1 = carry
        h0 = jnp.tanh(jnp.dot(x_t.astype(bf), wih0, preferred_element_type=jnp.float32)
                      + jnp.dot(h0.astype(bf), whh0, preferred_element_type=jnp.float32) + b0)
        h1 = jnp.tanh(jnp.dot(h0.astype(bf), wih1, preferred_element_type=jnp.float32)
                      + jnp.dot(h1.astype(bf), whh1, preferred_element_type=jnp.float32) + b1)
        return (h0, h1), h1[-1, :]

    init = (jnp.zeros((win, H), jnp.float32), jnp.zeros((win, H), jnp.float32))
    (h0, h1), last = lax.scan(step, init, x)
    out = jnp.dot(last, params["w_ro"].T) + params["b_ro"]
    return out, (h0, h1)


if __name__ == "__main__":
    # Small shapes consistent with the module (original: B=50, C=2, 34x34, win=15,
    # hidden=512, classes=10).
    B = 2            # batch_size -> RNN sequence length (seq-first default)
    CH, HH, WW = 2, 8, 8
    T_TOTAL = 10
    WIN = 8          # win -> RNN batch dim
    HIDDEN = 128
    NUM_CLASSES = 10
    I = CH * HH * WW  # 128 = input_size

    key = jax.random.PRNGKey(0)
    ks = jax.random.split(key, 11)
    bound = 1.0 / jnp.sqrt(jnp.float32(HIDDEN))

    def u(k, shape):
        return jax.random.uniform(k, shape, jnp.float32, -bound, bound)

    params = dict(
        w_ih0=u(ks[0], (HIDDEN, I)),      w_hh0=u(ks[1], (HIDDEN, HIDDEN)),
        b_ih0=u(ks[2], (HIDDEN,)),        b_hh0=u(ks[3], (HIDDEN,)),
        w_ih1=u(ks[4], (HIDDEN, HIDDEN)), w_hh1=u(ks[5], (HIDDEN, HIDDEN)),
        b_ih1=u(ks[6], (HIDDEN,)),        b_hh1=u(ks[7], (HIDDEN,)),
        w_ro=u(ks[8], (NUM_CLASSES, HIDDEN)),
        b_ro=u(ks[9], (NUM_CLASSES,)),
    )
    x5d = jax.random.normal(ks[10], (B, CH, HH, WW, T_TOTAL), jnp.float32)

    out, (h_n, h_c) = rnn_model_forward(x5d, params, h_state=None, win=WIN)
    out = jax.block_until_ready(out)
    h_n = jax.block_until_ready(h_n)
    h_c = jax.block_until_ready(h_c)

    # Correctness check against a pure-JAX reference with matching bf16-matmul /
    # f32-accumulate numerics.
    ref_out, (ref_h_n, ref_h_c) = _reference_forward(x5d, params, WIN)
    assert out.shape == (B, NUM_CLASSES)
    assert h_n.shape == (WIN, HIDDEN) and h_c.shape == (WIN, HIDDEN)
    assert jnp.allclose(out, ref_out, rtol=1e-3, atol=1e-3)
    assert jnp.allclose(h_n, ref_h_n, rtol=1e-3, atol=1e-3)
    assert jnp.allclose(h_c, ref_h_c, rtol=1e-3, atol=1e-3)

    print("KERNEL_OK")
</pallas_src>

<mosaic_0001>
module attributes {stable_mosaic.version = 11 : i64} {
  func.func @_rnn_recurrent_kernel(%arg0: i32, %arg1: memref<8x8x128xf32, #tpu.memory_space<vmem>>, %arg2: memref<128x128xbf16, #tpu.memory_space<vmem>>, %arg3: memref<128x128xbf16, #tpu.memory_space<vmem>>, %arg4: memref<128x128xbf16, #tpu.memory_space<vmem>>, %arg5: memref<1x128xf32, #tpu.memory_space<vmem>>, %arg6: memref<1x8x128xf32, #tpu.memory_space<vmem>>, %arg7: memref<2x8x128xf32, #tpu.memory_space<vmem>>, %arg8: memref<8x128xf32, #tpu.memory_space<vmem>>, %arg9: memref<8x128xf32, #tpu.memory_space<vmem>>) attributes {dimension_semantics = [#tpu.dimension_semantics<arbitrary>], iteration_bounds = array<i64: 1>, scalar_prefetch = 0 : i64, scratch_operands = 2 : i64, tpu.core_type = #tpu.core_type<tc>, window_params = [{transform_indices = @transform_0, window_bounds = array<i64: 8, 8, 128>}, {pipeline_mode = #tpu.pipeline_mode<synchronous>, transform_indices = @transform_1, window_bounds = array<i64: 128, 128>}, {pipeline_mode = #tpu.pipeline_mode<synchronous>, transform_indices = @transform_2, window_bounds = array<i64: 128, 128>}, {pipeline_mode = #tpu.pipeline_mode<synchronous>, transform_indices = @transform_3, window_bounds = array<i64: 128, 128>}, {pipeline_mode = #tpu.pipeline_mode<synchronous>, transform_indices = @transform_4, window_bounds = array<i64: 1, 128>}, {transform_indices = @transform_5, window_bounds = array<i64: 1, 8, 128>}, {pipeline_mode = #tpu.pipeline_mode<synchronous>, transform_indices = @transform_6, window_bounds = array<i64: 2, 8, 128>}]} {
    %c0_i32 = arith.constant 0 : i32
    %0 = arith.cmpi eq, %arg0, %c0_i32 : i32
    %1 = arith.extui %0 : i1 to i32
    %c0_i32_0 = arith.constant 0 : i32
    %2 = arith.cmpi ne, %1, %c0_i32_0 : i32
    scf.if %2 {
      %cst_62 = arith.constant 0.000000e+00 : f32
      %138 = vector.broadcast %cst_62 : f32 to vector<8x128xf32>
      %c0_63 = arith.constant 0 : index
      %c0_64 = arith.constant 0 : index
      %139 = vector.load %arg8[%c0_63, %c0_64] : memref<8x128xf32, #tpu.memory_space<vmem>>, vector<8x128xf32>
      tpu.vector_store %arg8[%c0_63, %c0_64], %138 {strides = array<i32>} : memref<8x128xf32, #tpu.memory_space<vmem>>, vector<8x128xf32>,
      %cst_65 = arith.constant 0.000000e+00 : f32
      %140 = vector.broadcast %cst_65 : f32 to vector<8x128xf32>
      %c0_66 = arith.constant 0 : index
      %c0_67 = arith.constant 0 : index
      %141 = vector.load %arg9[%c0_66, %c0_67] : memref<8x128xf32, #tpu.memory_space<vmem>>, vector<8x128xf32>
      tpu.vector_store %arg9[%c0_66, %c0_67], %140 {strides = array<i32>} : memref<8x128xf32, #tpu.memory_space<vmem>>, vector<8x128xf32>,
    } else {
    }
    %c0 = arith.constant 0 : index
    %c0_1 = arith.constant 0 : index
    %3 = vector.load %arg2[%c0, %c0_1] : memref<128x128xbf16, #tpu.memory_space<vmem>>, vector<128x128xbf16>
    %c0_2 = arith.constant 0 : index
    %c0_3 = arith.constant 0 : index
    %4 = vector.load %arg3[%c0_2, %c0_3] : memref<128x128xbf16, #tpu.memory_space<vmem>>, vector<128x128xbf16>
    %c0_4 = arith.constant 0 : index
    %c0_5 = arith.constant 0 : index
    %5 = vector.load %arg4[%c0_4, %c0_5] : memref<128x128xbf16, #tpu.memory_space<vmem>>, vector<128x128xbf16>
    %c0_6 = arith.constant 0 : index
    %c0_7 = arith.constant 0 : index
    %6 = vector.load %arg5[%c0_6, %c0_7] : memref<1x128xf32, #tpu.memory_space<vmem>>, vector<1x128xf32>
    %7 = vector.shape_cast %6 : vector<1x128xf32> to vector<1x128xf32>
    %8 = vector.broadcast %7 : vector<1x128xf32> to vector<8x128xf32>
    %c0_8 = arith.constant 0 : index
    %c0_9 = arith.constant 0 : index
    %9 = vector.load %arg8[%c0_8, %c0_9] : memref<8x128xf32, #tpu.memory_space<vmem>>, vector<8x128xf32>
    %c0_10 = arith.constant 0 : index
    %c0_11 = arith.constant 0 : index
    %10 = vector.load %arg9[%c0_10, %c0_11] : memref<8x128xf32, #tpu.memory_space<vmem>>, vector<8x128xf32>
    %11 = arith.truncf %9 : vector<8x128xf32> to vector<8x128xbf16>
    %c0_i32_12 = arith.constant 0 : i32
    %12 = arith.cmpi eq, %arg0, %c0_i32_12 : i32
    %13 = arith.truncf %10 : vector<8x128xf32> to vector<8x128xbf16>
    %cst = arith.constant dense<0.000000e+00> : vector<8x128xf32>
    %14 = tpu.matmul %13, %5, %cst {dimension_numbers = #tpu.dot_dimension_numbers<[1], [0], [0], [1], [0, 0, 1, 1], [], []>} : vector<8x128xbf16>, vector<128x128xbf16>, vector<8x128xf32> -> vector<8x128xf32>
    %c0_13 = arith.constant 0 : index
    %c0_14 = arith.constant 0 : index
    %c0_15 = arith.constant 0 : index
    %15 = vector.load %arg1[%c0_13, %c0_14, %c0_15] : memref<8x8x128xf32, #tpu.memory_space<vmem>>, vector<1x8x128xf32>
    %16 = vector.shape_cast %15 : vector<1x8x128xf32> to vector<8x128xf32>
    %cst_16 = arith.constant dense<0.000000e+00> : vector<8x128xf32>
    %17 = tpu.matmul %11, %3, %cst_16 {dimension_numbers = #tpu.dot_dimension_numbers<[1], [0], [0], [1], [0, 0, 1, 1], [], []>} : vector<8x128xbf16>, vector<128x128xbf16>, vector<8x128xf32> -> vector<8x128xf32>
    %18 = arith.addf %16, %17 : vector<8x128xf32>
    %19 = math.tanh %18 : vector<8x128xf32>
    %20 = arith.truncf %19 : vector<8x128xf32> to vector<8x128xbf16>
    %cst_17 = arith.constant dense<0.000000e+00> : vector<8x128xf32>
    %21 = tpu.matmul %20, %4, %cst_17 {dimension_numbers = #tpu.dot_dimension_numbers<[1], [0], [0], [1], [0, 0, 1, 1], [], []>} : vector<8x128xbf16>, vector<128x128xbf16>, vector<8x128xf32> -> vector<8x128xf32>
    %22 = arith.addf %14, %21 : vector<8x128xf32>
    %23 = arith.addf %22, %8 : vector<8x128xf32>
    %24 = math.tanh %23 : vector<8x128xf32>
    %25 = vector.extract_strided_slice %24 {offsets = [7, 0], sizes = [1, 128], strides = [1, 1]} : vector<8x128xf32> to vector<1x128xf32>
    %26 = arith.truncf %24 : vector<8x128xf32> to vector<8x128xbf16>
    %cst_18 = arith.constant dense<0.000000e+00> : vector<8x128xf32>
    %27 = tpu.matmul %26, %5, %cst_18 {dimension_numbers = #tpu.dot_dimension_numbers<[1], [0], [0], [1], [0, 0, 1, 1], [], []>} : vector<8x128xbf16>, vector<128x128xbf16>, vector<8x128xf32> -> vector<8x128xf32>
    %c1 = arith.constant 1 : index
    %c0_19 = arith.constant 0 : index
    %c0_20 = arith.constant 0 : index
    %28 = vector.load %arg1[%c1, %c0_19, %c0_20] : memref<8x8x128xf32, #tpu.memory_space<vmem>>, vector<1x8x128xf32>
    %29 = vector.shape_cast %28 : vector<1x8x128xf32> to vector<8x128xf32>
    %cst_21 = arith.constant dense<0.000000e+00> : vector<8x128xf32>
    %30 = tpu.matmul %20, %3, %cst_21 {dimension_numbers = #tpu.dot_dimension_numbers<[1], [0], [0], [1], [0, 0, 1, 1], [], []>} : vector<8x128xbf16>, vector<128x128xbf16>, vector<8x128xf32> -> vector<8x128xf32>
    %31 = arith.addf %29, %30 : vector<8x128xf32>
    %32 = math.tanh %31 : vector<8x128xf32>
    %33 = arith.truncf %32 : vector<8x128xf32> to vector<8x128xbf16>
    %cst_22 = arith.constant dense<0.000000e+00> : vector<8x128xf32>
    %34 = tpu.matmul %33, %4, %cst_22 {dimension_numbers = #tpu.dot_dimension_numbers<[1], [0], [0], [1], [0, 0, 1, 1], [], []>} : vector<8x128xbf16>, vector<128x128xbf16>, vector<8x128xf32> -> vector<8x128xf32>
    %35 = arith.addf %27, %34 : vector<8x128xf32>
    %36 = arith.addf %35, %8 : vector<8x128xf32>
    %37 = math.tanh %36 : vector<8x128xf32>
    %38 = vector.extract_strided_slice %37 {offsets = [7, 0], sizes = [1, 128], strides = [1, 1]} : vector<8x128xf32> to vector<1x128xf32>
    %39 = arith.truncf %37 : vector<8x128xf32> to vector<8x128xbf16>
    %cst_23 = arith.constant dense<0.000000e+00> : vector<8x128xf32>
    %40 = tpu.matmul %39, %5, %cst_23 {dimension_numbers = #tpu.dot_dimension_numbers<[1], [0], [0], [1], [0, 0, 1, 1], [], []>} : vector<8x128xbf16>, vector<128x128xbf16>, vector<8x128xf32> -> vector<8x128xf32>
    %c2 = arith.constant 2 : index
    %c0_24 = arith.constant 0 : index
    %c0_25 = arith.constant 0 : index
    %41 = vector.load %arg1[%c2, %c0_24, %c0_25] : memref<8x8x128xf32, #tpu.memory_space<vmem>>, vector<1x8x128xf32>
    %42 = vector.shape_cast %41 : vector<1x8x128xf32> to vector<8x128xf32>
    %cst_26 = arith.constant dense<0.000000e+00> : vector<8x128xf32>
    %43 = tpu.matmul %33, %3, %cst_26 {dimension_numbers = #tpu.dot_dimension_numbers<[1], [0], [0], [1], [0, 0, 1, 1], [], []>} : vector<8x128xbf16>, vector<128x128xbf16>, vector<8x128xf32> -> vector<8x128xf32>
    %44 = arith.addf %42, %43 : vector<8x128xf32>
    %45 = math.tanh %44 : vector<8x128xf32>
    %46 = arith.truncf %45 : vector<8x128xf32> to vector<8x128xbf16>
    %cst_27 = arith.constant dense<0.000000e+00> : vector<8x128xf32>
    %47 = tpu.matmul %46, %4, %cst_27 {dimension_numbers = #tpu.dot_dimension_numbers<[1], [0], [0], [1], [0, 0, 1, 1], [], []>} : vector<8x128xbf16>, vector<128x128xbf16>, vector<8x128xf32> -> vector<8x128xf32>
    %48 = arith.addf %40, %47 : vector<8x128xf32>
    %49 = arith.addf %48, %8 : vector<8x128xf32>
    %50 = math.tanh %49 : vector<8x128xf32>
    %51 = arith.select %12, %32, %45 : vector<8x128xf32>
    %52 = arith.select %12, %37, %50 : vector<8x128xf32>
    %53 = vector.extract_strided_slice %52 {offsets = [7, 0], sizes = [1, 128], strides = [1, 1]} : vector<8x128xf32> to vector<1x128xf32>
    %54 = arith.truncf %52 : vector<8x128xf32> to vector<8x128xbf16>
    %cst_28 = arith.constant dense<0.000000e+00> : vector<8x128xf32>
    %55 = tpu.matmul %54, %5, %cst_28 {dimension_numbers = #tpu.dot_dimension_numbers<[1], [0], [0], [1], [0, 0, 1, 1], [], []>} : vector<8x128xbf16>, vector<128x128xbf16>, vector<8x128xf32> -> vector<8x128xf32>
    %c3 = arith.constant 3 : index
    %c0_29 = arith.constant 0 : index
    %c0_30 = arith.constant 0 : index
    %56 = vector.load %arg1[%c3, %c0_29, %c0_30] : memref<8x8x128xf32, #tpu.memory_space<vmem>>, vector<1x8x128xf32>
    %57 = vector.shape_cast %56 : vector<1x8x128xf32> to vector<8x128xf32>
    %cst_31 = arith.constant dense<0.000000e+00> : vector<8x128xf32>
    %58 = tpu.matmul %46, %3, %cst_31 {dimension_numbers = #tpu.dot_dimension_numbers<[1], [0], [0], [1], [0, 0, 1, 1], [], []>} : vector<8x128xbf16>, vector<128x128xbf16>, vector<8x128xf32> -> vector<8x128xf32>
    %59 = arith.addf %57, %58 : vector<8x128xf32>
    %60 = math.tanh %59 : vector<8x128xf32>
    %61 = arith.truncf %60 : vector<8x128xf32> to vector<8x128xbf16>
    %cst_32 = arith.constant dense<0.000000e+00> : vector<8x128xf32>
    %62 = tpu.matmul %61, %4, %cst_32 {dimension_numbers = #tpu.dot_dimension_numbers<[1], [0], [0], [1], [0, 0, 1, 1], [], []>} : vector<8x128xbf16>, vector<128x128xbf16>, vector<8x128xf32> -> vector<8x128xf32>
    %63 = arith.addf %55, %62 : vector<8x128xf32>
    %64 = arith.addf %63, %8 : vector<8x128xf32>
    %65 = math.tanh %64 : vector<8x128xf32>
    %66 = arith.select %12, %51, %60 : vector<8x128xf32>
    %67 = arith.select %12, %52, %65 : vector<8x128xf32>
    %68 = vector.extract_strided_slice %67 {offsets = [7, 0], sizes = [1, 128], strides = [1, 1]} : vector<8x128xf32> to vector<1x128xf32>
    %69 = arith.truncf %67 : vector<8x128xf32> to vector<8x128xbf16>
    %cst_33 = arith.constant dense<0.000000e+00> : vector<8x128xf32>
    %70 = tpu.matmul %69, %5, %cst_33 {dimension_numbers = #tpu.dot_dimension_numbers<[1], [0], [0], [1], [0, 0, 1, 1], [], []>} : vector<8x128xbf16>, vector<128x128xbf16>, vector<8x128xf32> -> vector<8x128xf32>
    %c4 = arith.constant 4 : index
    %c0_34 = arith.constant 0 : index
    %c0_35 = arith.constant 0 : index
    %71 = vector.load %arg1[%c4, %c0_34, %c0_35] : memref<8x8x128xf32, #tpu.memory_space<vmem>>, vector<1x8x128xf32>
    %72 = vector.shape_cast %71 : vector<1x8x128xf32> to vector<8x128xf32>
    %cst_36 = arith.constant dense<0.000000e+00> : vector<8x128xf32>
    %73 = tpu.matmul %61, %3, %cst_36 {dimension_numbers = #tpu.dot_dimension_numbers<[1], [0], [0], [1], [0, 0, 1, 1], [], []>} : vector<8x128xbf16>, vector<128x128xbf16>, vector<8x128xf32> -> vector<8x128xf32>
    %74 = arith.addf %72, %73 : vector<8x128xf32>
    %75 = math.tanh %74 : vector<8x128xf32>
    %76 = arith.truncf %75 : vector<8x128xf32> to vector<8x128xbf16>
    %cst_37 = arith.constant dense<0.000000e+00> : vector<8x128xf32>
    %77 = tpu.matmul %76, %4, %cst_37 {dimension_numbers = #tpu.dot_dimension_numbers<[1], [0], [0], [1], [0, 0, 1, 1], [], []>} : vector<8x128xbf16>, vector<128x128xbf16>, vector<8x128xf32> -> vector<8x128xf32>
    %78 = arith.addf %70, %77 : vector<8x128xf32>
    %79 = arith.addf %78, %8 : vector<8x128xf32>
    %80 = math.tanh %79 : vector<8x128xf32>
    %81 = arith.select %12, %66, %75 : vector<8x128xf32>
    %82 = arith.select %12, %67, %80 : vector<8x128xf32>
    %83 = vector.extract_strided_slice %82 {offsets = [7, 0], sizes = [1, 128], strides = [1, 1]} : vector<8x128xf32> to vector<1x128xf32>
    %84 = arith.truncf %82 : vector<8x128xf32> to vector<8x128xbf16>
    %cst_38 = arith.constant dense<0.000000e+00> : vector<8x128xf32>
    %85 = tpu.matmul %84, %5, %cst_38 {dimension_numbers = #tpu.dot_dimension_numbers<[1], [0], [0], [1], [0, 0, 1, 1], [], []>} : vector<8x128xbf16>, vector<128x128xbf16>, vector<8x128xf32> -> vector<8x128xf32>
    %c5 = arith.constant 5 : index
    %c0_39 = arith.constant 0 : index
    %c0_40 = arith.constant 0 : index
    %86 = vector.load %arg1[%c5, %c0_39, %c0_40] : memref<8x8x128xf32, #tpu.memory_space<vmem>>, vector<1x8x128xf32>
    %87 = vector.shape_cast %86 : vector<1x8x128xf32> to vector<8x128xf32>
    %cst_41 = arith.constant dense<0.000000e+00> : vector<8x128xf32>
    %88 = tpu.matmul %76, %3, %cst_41 {dimension_numbers = #tpu.dot_dimension_numbers<[1], [0], [0], [1], [0, 0, 1, 1], [], []>} : vector<8x128xbf16>, vector<128x128xbf16>, vector<8x128xf32> -> vector<8x128xf32>
    %89 = arith.addf %87, %88 : vector<8x128xf32>
    %90 = math.tanh %89 : vector<8x128xf32>
    %91 = arith.truncf %90 : vector<8x128xf32> to vector<8x128xbf16>
    %cst_42 = arith.constant dense<0.000000e+00> : vector<8x128xf32>
    %92 = tpu.matmul %91, %4, %cst_42 {dimension_numbers = #tpu.dot_dimension_numbers<[1], [0], [0], [1], [0, 0, 1, 1], [], []>} : vector<8x128xbf16>, vector<128x128xbf16>, vector<8x128xf32> -> vector<8x128xf32>
    %93 = arith.addf %85, %92 : vector<8x128xf32>
    %94 = arith.addf %93, %8 : vector<8x128xf32>
    %95 = math.tanh %94 : vector<8x128xf32>
    %96 = arith.select %12, %81, %90 : vector<8x128xf32>
    %97 = arith.select %12, %82, %95 : vector<8x128xf32>
    %98 = vector.extract_strided_slice %97 {offsets = [7, 0], sizes = [1, 128], strides = [1, 1]} : vector<8x128xf32> to vector<1x128xf32>
    %99 = arith.truncf %97 : vector<8x128xf32> to vector<8x128xbf16>
    %cst_43 = arith.constant dense<0.000000e+00> : vector<8x128xf32>
    %100 = tpu.matmul %99, %5, %cst_43 {dimension_numbers = #tpu.dot_dimension_numbers<[1], [0], [0], [1], [0, 0, 1, 1], [], []>} : vector<8x128xbf16>, vector<128x128xbf16>, vector<8x128xf32> -> vector<8x128xf32>
    %c6 = arith.constant 6 : index
    %c0_44 = arith.constant 0 : index
    %c0_45 = arith.constant 0 : index
    %101 = vector.load %arg1[%c6, %c0_44, %c0_45] : memref<8x8x128xf32, #tpu.memory_space<vmem>>, vector<1x8x128xf32>
    %102 = vector.shape_cast %101 : vector<1x8x128xf32> to vector<8x128xf32>
    %cst_46 = arith.constant dense<0.000000e+00> : vector<8x128xf32>
    %103 = tpu.matmul %91, %3, %cst_46 {dimension_numbers = #tpu.dot_dimension_numbers<[1], [0], [0], [1], [0, 0, 1, 1], [], []>} : vector<8x128xbf16>, vector<128x128xbf16>, vector<8x128xf32> -> vector<8x128xf32>
    %104 = arith.addf %102, %103 : vector<8x128xf32>
    %105 = math.tanh %104 : vector<8x128xf32>
    %106 = arith.truncf %105 : vector<8x128xf32> to vector<8x128xbf16>
    %cst_47 = arith.constant dense<0.000000e+00> : vector<8x128xf32>
    %107 = tpu.matmul %106, %4, %cst_47 {dimension_numbers = #tpu.dot_dimension_numbers<[1], [0], [0], [1], [0, 0, 1, 1], [], []>} : vector<8x128xbf16>, vector<128x128xbf16>, vector<8x128xf32> -> vector<8x128xf32>
    %108 = arith.addf %100, %107 : vector<8x128xf32>
    %109 = arith.addf %108, %8 : vector<8x128xf32>
    %110 = math.tanh %109 : vector<8x128xf32>
    %111 = arith.select %12, %96, %105 : vector<8x128xf32>
    %112 = arith.select %12, %97, %110 : vector<8x128xf32>
    %113 = vector.extract_strided_slice %112 {offsets = [7, 0], sizes = [1, 128], strides = [1, 1]} : vector<8x128xf32> to vector<1x128xf32>
    %114 = arith.truncf %112 : vector<8x128xf32> to vector<8x128xbf16>
    %cst_48 = arith.constant dense<0.000000e+00> : vector<8x128xf32>
    %115 = tpu.matmul %114, %5, %cst_48 {dimension_numbers = #tpu.dot_dimension_numbers<[1], [0], [0], [1], [0, 0, 1, 1], [], []>} : vector<8x128xbf16>, vector<128x128xbf16>, vector<8x128xf32> -> vector<8x128xf32>
    %c7 = arith.constant 7 : index
    %c0_49 = arith.constant 0 : index
    %c0_50 = arith.constant 0 : index
    %116 = vector.load %arg1[%c7, %c0_49, %c0_50] : memref<8x8x128xf32, #tpu.memory_space<vmem>>, vector<1x8x128xf32>
    %117 = vector.shape_cast %116 : vector<1x8x128xf32> to vector<8x128xf32>
    %cst_51 = arith.constant dense<0.000000e+00> : vector<8x128xf32>
    %118 = tpu.matmul %106, %3, %cst_51 {dimension_numbers = #tpu.dot_dimension_numbers<[1], [0], [0], [1], [0, 0, 1, 1], [], []>} : vector<8x128xbf16>, vector<128x128xbf16>, vector<8x128xf32> -> vector<8x128xf32>
    %119 = arith.addf %117, %118 : vector<8x128xf32>
    %120 = math.tanh %119 : vector<8x128xf32>
    %121 = arith.truncf %120 : vector<8x128xf32> to vector<8x128xbf16>
    %cst_52 = arith.constant dense<0.000000e+00> : vector<8x128xf32>
    %122 = tpu.matmul %121, %4, %cst_52 {dimension_numbers = #tpu.dot_dimension_numbers<[1], [0], [0], [1], [0, 0, 1, 1], [], []>} : vector<8x128xbf16>, vector<128x128xbf16>, vector<8x128xf32> -> vector<8x128xf32>
    %123 = arith.addf %115, %122 : vector<8x128xf32>
    %124 = arith.addf %123, %8 : vector<8x128xf32>
    %125 = math.tanh %124 : vector<8x128xf32>
    %126 = arith.select %12, %111, %120 : vector<8x128xf32>
    %127 = arith.select %12, %112, %125 : vector<8x128xf32>
    %128 = vector.extract_strided_slice %127 {offsets = [7, 0], sizes = [1, 128], strides = [1, 1]} : vector<8x128xf32> to vector<1x128xf32>
    %c0_53 = arith.constant 0 : index
    %c0_54 = arith.constant 0 : index
    %129 = vector.load %arg8[%c0_53, %c0_54] : memref<8x128xf32, #tpu.memory_space<vmem>>, vector<8x128xf32>
    tpu.vector_store %arg8[%c0_53, %c0_54], %126 {strides = array<i32>} : memref<8x128xf32, #tpu.memory_space<vmem>>, vector<8x128xf32>,
    %c0_55 = arith.constant 0 : index
    %c0_56 = arith.constant 0 : index
    %130 = vector.load %arg9[%c0_55, %c0_56] : memref<8x128xf32, #tpu.memory_space<vmem>>, vector<8x128xf32>
    tpu.vector_store %arg9[%c0_55, %c0_56], %127 {strides = array<i32>} : memref<8x128xf32, #tpu.memory_space<vmem>>, vector<8x128xf32>,
    %131 = tpu.concatenate %25, %38, %53, %68, %83, %98, %113, %128 in 0 : vector<1x128xf32>, vector<1x128xf32>, vector<1x128xf32>, vector<1x128xf32>, vector<1x128xf32>, vector<1x128xf32>, vector<1x128xf32>, vector<1x128xf32> -> vector<8x128xf32>
    %c0_57 = arith.constant 0 : index
    %c0_58 = arith.constant 0 : index
    %c0_59 = arith.constant 0 : index
    %132 = vector.load %arg6[%c0_57, %c0_58, %c0_59] : memref<1x8x128xf32, #tpu.memory_space<vmem>>, vector<1x8x128xf32>
    %133 = vector.shape_cast %132 : vector<1x8x128xf32> to vector<8x128xf32>
    %134 = vector.shape_cast %131 : vector<8x128xf32> to vector<1x8x128xf32>
    tpu.vector_store %arg6[%c0_57, %c0_58, %c0_59], %134 {strides = array<i32>} : memref<1x8x128xf32, #tpu.memory_space<vmem>>, vector<1x8x128xf32>,
    %c0_i32_60 = arith.constant 0 : i32
    %135 = arith.cmpi eq, %arg0, %c0_i32_60 : i32
    %136 = arith.extui %135 : i1 to i32
    %c0_i32_61 = arith.constant 0 : i32
    %137 = arith.cmpi ne, %136, %c0_i32_61 : i32
    scf.if %137 {
      %c0_62 = arith.constant 0 : index
      %c0_63 = arith.constant 0 : index
      %c0_64 = arith.constant 0 : index
      %138 = vector.load %arg7[%c0_62, %c0_63, %c0_64] : memref<2x8x128xf32, #tpu.memory_space<vmem>>, vector<1x8x128xf32>
      %139 = vector.shape_cast %138 : vector<1x8x128xf32> to vector<8x128xf32>
      %140 = vector.shape_cast %126 : vector<8x128xf32> to vector<1x8x128xf32>
      tpu.vector_store %arg7[%c0_62, %c0_63, %c0_64], %140 {strides = array<i32>} : memref<2x8x128xf32, #tpu.memory_space<vmem>>, vector<1x8x128xf32>,
      %c1_65 = arith.constant 1 : index
      %c0_66 = arith.constant 0 : index
      %c0_67 = arith.constant 0 : index
      %141 = vector.load %arg7[%c1_65, %c0_66, %c0_67] : memref<2x8x128xf32, #tpu.memory_space<vmem>>, vector<1x8x128xf32>
      %142 = vector.shape_cast %141 : vector<1x8x128xf32> to vector<8x128xf32>
      %143 = vector.shape_cast %127 : vector<8x128xf32> to vector<1x8x128xf32>
      tpu.vector_store %arg7[%c1_65, %c0_66, %c0_67], %143 {strides = array<i32>} : memref<2x8x128xf32, #tpu.memory_space<vmem>>, vector<1x8x128xf32>,
    } else {
    }
    return
  }
  func.func @transform_0(%arg0: i32) -> (i32, i32, i32) {
    %c0_i32 = arith.constant 0 : i32
    %c0_i32_0 = arith.constant 0 : i32
    %c0_i32_1 = arith.constant 0 : i32
    return %arg0, %c0_i32, %c0_i32_0 : i32, i32, i32
  }
  func.func @transform_1(%arg0: i32) -> (i32, i32) {
    %c0_i32 = arith.constant 0 : i32
    %c0_i32_0 = arith.constant 0 : i32
    %c0_i32_1 = arith.constant 0 : i32
    return %c0_i32, %c0_i32_0 : i32, i32
  }
  func.func @transform_2(%arg0: i32) -> (i32, i32) {
    %c0_i32 = arith.constant 0 : i32
    %c0_i32_0 = arith.constant 0 : i32
    %c0_i32_1 = arith.constant 0 : i32
    return %c0_i32, %c0_i32_0 : i32, i32
  }
  func.func @transform_3(%arg0: i32) -> (i32, i32) {
    %c0_i32 = arith.constant 0 : i32
    %c0_i32_0 = arith.constant 0 : i32
    %c0_i32_1 = arith.constant 0 : i32
    return %c0_i32, %c0_i32_0 : i32, i32
  }
  func.func @transform_4(%arg0: i32) -> (i32, i32) {
    %c0_i32 = arith.constant 0 : i32
    %c0_i32_0 = arith.constant 0 : i32
    %c0_i32_1 = arith.constant 0 : i32
    return %c0_i32, %c0_i32_0 : i32, i32
  }
  func.func @transform_5(%arg0: i32) -> (i32, i32, i32) {
    %c0_i32 = arith.constant 0 : i32
    %c0_i32_0 = arith.constant 0 : i32
    %c0_i32_1 = arith.constant 0 : i32
    return %arg0, %c0_i32, %c0_i32_0 : i32, i32, i32
  }
  func.func @transform_6(%arg0: i32) -> (i32, i32, i32) {
    %c0_i32 = arith.constant 0 : i32
    %c0_i32_0 = arith.constant 0 : i32
    %c0_i32_1 = arith.constant 0 : i32
    %c0_i32_2 = arith.constant 0 : i32
    return %c0_i32, %c0_i32_0, %c0_i32_1 : i32, i32, i32
  }
}

</mosaic_0001>

<bundles_post_ra>
// kernel: tpu_custom_call.1
= control target key start
LH: loop header
LB: loop body
LE: loop exit
PB: predicated region body
PF: predicated region fallthrough
CT: control target
= control target key end

     0   :  { %12 = vsyncpa [#allocation5], 0  ;;  %s1385_s0 = inlined_call_operand.hbm [shape: f32[8,8,128], index: 0, kind: input, shape index: {}]   ;;  %s1386_s1 = inlined_call_operand.hbm [shape: bf16[128,128], index: 1, kind: input, shape index: {}]   ;;  %s1387_s2 = inlined_call_operand.hbm [shape: bf16[128,128], index: 2, kind: input, shape index: {}]   ;;  %s1388_s3 = inlined_call_operand.hbm [shape: bf16[128,128], index: 3, kind: input, shape index: {}]   ;;  %s1389_s4 = inlined_call_operand.vmem [shape: f32[1,128], index: 4, kind: input, shape index: {}]   ;;  %s1390_s5 = inlined_call_operand.hbm [shape: f32[1,8,128], index: 5, kind: output, shape index: {0}]   ;;  %s1391_s6 = inlined_call_operand.hbm [shape: f32[2,8,128], index: 6, kind: output, shape index: {1}]  }
   0x1   :  { %13 = vsyncpa [#allocation8], 0 }
   0x2   :  { %14 = vsyncpa [#allocation11], 0 }
   0x3   :  { %15 = vsyncpa [#allocation6], 0  ;;  %s34_s23 = sshll.u32 %s1386_s1, 4  ;;  %s35_s23 = int_to_ptr.hbm [resolvable:$true] %s34_s23 }
   0x4   :  { %16 = vsyncpa [#allocation14], 0  ;;  %s1064_s24 = smov [#allocation7]   ;;  %s21_s28 = sshll.u32 %s1385_s0, 4  ;;  %s22_s28 = int_to_ptr.hbm [resolvable:$true] %s21_s28 }
   0x5   :  { %s36_s25 = sshll.u32 %s1064_s24, 4  ;;  %s1065_s29 = smov 64   ;;  %s37_s25 = int_to_ptr.vmem [resolvable:$true] %s36_s25 }
   0x6   :  { %s1066_s30 = smov 4   ;;  %s1067_s7 = smov [#allocation4]  }
   0x7   :  { %42 = dma.hbm_to_vmem [thread:$0]  %s35_s23, 1024, %s37_s25, [#allocation8], %s1065_s29, %s1065_s29, %s1066_s30  }
   0x8   :  { %s23_s8 = sshll.u32 %s1067_s7, 4  ;;  %s1068_s9 = smov 128   ;;  %s24_s8 = int_to_ptr.vmem [resolvable:$true] %s23_s8 }
   0x9   :  { %s1069_s10 = smov 8   ;;  %s47_s12 = sshll.u32 %s1387_s2, 4  ;;  %s48_s12 = int_to_ptr.hbm [resolvable:$true] %s47_s12 }
   0xa   :  { %29 = dma.hbm_to_vmem [thread:$0]  %s22_s28, 1024, %s24_s8, [#allocation5], %s1068_s9, %s1068_s9, %s1069_s10  }
   0xb   :  { %s1070_s13 = smov [#allocation9]   ;;  %s60_s16 = sshll.u32 %s1388_s3, 4  ;;  %s61_s16 = int_to_ptr.hbm [resolvable:$true] %s60_s16 }
   0xc   :  { %s49_s0 = sshll.u32 %s1070_s13, 4  ;;  %s1071_s17 = smov [#allocation10]   ;;  %s50_s0 = int_to_ptr.vmem [resolvable:$true] %s49_s0 }
   0xd   :  { %55 = dma.hbm_to_vmem [thread:$0]  %s48_s12, 1024, %s50_s0, [#allocation8], %s1065_s29, %s1065_s29, %s1066_s30  }
   0xe   :  { %s62_s18 = sshll.u32 %s1071_s17, 4  ;;  %s63_s18 = int_to_ptr.vmem [resolvable:$true] %s62_s18 }
   0xf   :  { %68 = dma.hbm_to_vmem [thread:$0]  %s61_s16, 1024, %s63_s18, [#allocation11], %s1065_s29, %s1065_s29, %s1066_s30  }
  0x10   :  { %1054 = dma.done.wait [#allocation5], 1024  }
  0x11   :  { %1055 = vsyncadd [#allocation5], 4294966272 }
  0x12   :  { %1056 = dma.done.wait [#allocation8], 2048  }
  0x13   :  { %1057 = vsyncadd [#allocation8], 4294965248 }
  0x14   :  { %1058 = dma.done.wait [#allocation11], 1024  }
  0x15   :  { %1059 = vsyncadd [#allocation11], 4294966272  ;;  %v1125_v0 = vld [vmem:[#allocation7 + $0x38] sm:$0xff]  ;;  %v1128_v1 = vld [vmem:[#allocation7 + $0x30] sm:$0xff]  ;;  %v1072_v20 = vmov 0.0|0.0   ;;  %vm700_vm0 = vcmask 1040384  }
  0x16   :  { %198 = vmatpush.bf16.msra.mxu0 %v1125_v0  ;;  %v1130_v2 = vld [vmem:[#allocation10 + $0x38] sm:$0xff]  ;;  %341 = vmatpush.bf16.msra.mxu3 %v1125_v0  ;;  %v1136_v4 = vld [vmem:[#allocation10 + $0x30] sm:$0xff]  ;;  %v1142_v6 = vld [vmem:[#allocation7 + $0x28] sm:$0xff]  ;;  %vm702_vm1 = vcmask 1041408   ;;  %vm704_vm2 = vcmask 1042432   ;;  %vm706_vm3 = vcmask 1043456  }
  0x17   :  { %v1133_v3 = vld [vmem:[#allocation9 + $0x38] sm:$0xff]  ;;  %323 = vmatpush.bf16.msra.mxu2 %v1130_v2  ;;  %v1139_v5 = vld [vmem:[#allocation9 + $0x30] sm:$0xff]  ;;  %v1146_v7 = vld [vmem:[#allocation10 + $0x28] sm:$0xff]  ;;  %vm708_vm4 = vcmask 1044480   ;;  %vm710_vm5 = vcmask 1045504   ;;  %vm712_vm6 = vcmask 1046528  }
  0x18   :  { %262 = vmatpush.bf16.msra.mxu1 %v1133_v3  ;;  %v1149_v8 = vld [vmem:[#allocation9 + $0x28] sm:$0xff]  ;;  %v1152_v9 = vld [vmem:[#allocation7 + $0x20] sm:$0xff]  ;;  %v1162_v12 = vld [vmem:[#allocation7 + $0x18] sm:$0xff]  ;;  %s728_s22 = sshll.u32 %s1390_s5, 4  ;;  %s1074_s23 = smov [#allocation13]   ;;  %s729_s22 = int_to_ptr.hbm [resolvable:$true] %s728_s22 }
  0x19   :  { %v1156_v10 = vld [vmem:[#allocation10 + $0x20] sm:$0xff]  ;;  %v1166_v13 = vld [vmem:[#allocation10 + $0x18] sm:$0xff]  ;;  %v1172_v15 = vld [vmem:[#allocation7 + $0x10] sm:$0xff]  ;;  %s736_s24 = sshll.u32 %s1074_s23, 4  ;;  %s738_s27 = sshll.u32 %s1391_s6, 4  ;;  %s737_s24 = int_to_ptr.vmem [resolvable:$true] %s736_s24  ;;  %s739_s27 = int_to_ptr.hbm [resolvable:$true] %s738_s27 }
  0x1a   :  { %199 = vmatpush.bf16.msra.mxu0 %v1128_v1  ;;  %342 = vmatpush.bf16.msra.mxu3 %v1128_v1  ;;  %v1159_v11 = vld [vmem:[#allocation9 + $0x20] sm:$0xff]  ;;  %v1169_v14 = vld [vmem:[#allocation9 + $0x18] sm:$0xff]  ;;  %v1176_v16 = vld [vmem:[#allocation10 + $0x10] sm:$0xff] }
  0x1b   :  { %324 = vmatpush.bf16.msra.mxu2 %v1136_v4  ;;  %v1180_v17 = vld [vmem:[#allocation7 + $0x8] sm:$0xff]  ;;  %v1187_v19 = vld [vmem:[#allocation7] sm:$0xff]  ;;  %v1203_v21 = vld [vmem:[#allocation9 + $0x10] sm:$0xff] }
  0x1c   :  { %263 = vmatpush.bf16.msra.mxu1 %v1139_v5  ;;  %v1184_v18 = vld [vmem:[#allocation10 + $0x8] sm:$0xff]  ;;  %v1206_v22 = vld [vmem:[#allocation10] sm:$0xff]  ;;  %v387_v51 = vld [vmem:[#allocation4 + $0x10] sm:$0xff] }
  0x1d   :  { %v1211_v23 = vld [vmem:[#allocation9 + $0x8] sm:$0xff]  ;;  %v1217_v24 = vld [vmem:[#allocation9] sm:$0xff] }
  0x1e   :  { %200 = vmatpush.bf16.msra.mxu0 %v1142_v6  ;;  %343 = vmatpush.bf16.msra.mxu3 %v1142_v6  ;;  %v149_v25 = vld [vmem:[#allocation4] sm:$0xff]  ;;  %v340_v37 = vld [vmem:[#allocation4 + $0x8] sm:$0xff] }
  0x1f   :  { %325 = vmatpush.bf16.msra.mxu2 %v1146_v7  ;;  %v889_v33 = vld [vmem:[%s1389_s4] ss:$0 sm:$0xff]  ;;  %s1073_s4 = smov [#allocation12]  }
  0x20   :  { %264 = vmatpush.bf16.msra.mxu1 %v1149_v8  ;;  %s726_s19 = sshll.u32 %s1073_s4, 4  ;;  %s727_s19 = int_to_ptr.vmem [resolvable:$true] %s726_s19 }
  0x22   :  { %201 = vmatpush.bf16.msra.mxu0 %v1152_v9  ;;  %344 = vmatpush.bf16.msra.mxu3 %v1152_v9 }
  0x23   :  { %326 = vmatpush.bf16.msra.mxu2 %v1156_v10 }
  0x24   :  { %265 = vmatpush.bf16.msra.mxu1 %v1159_v11 }
  0x26   :  { %202 = vmatpush.bf16.msra.mxu0 %v1162_v12  ;;  %345 = vmatpush.bf16.msra.mxu3 %v1162_v12 }
  0x27   :  { %327 = vmatpush.bf16.msra.mxu2 %v1166_v13 }
  0x28   :  { %266 = vmatpush.bf16.msra.mxu1 %v1169_v14 }
  0x2a   :  { %203 = vmatpush.bf16.msra.mxu0 %v1172_v15  ;;  %346 = vmatpush.bf16.msra.mxu3 %v1172_v15 }
  0x2b   :  { %328 = vmatpush.bf16.msra.mxu2 %v1176_v16 }
  0x2c   :  { %267 = vmatpush.bf16.msra.mxu1 %v1203_v21 }
  0x2e   :  { %204 = vmatpush.bf16.msra.mxu0 %v1180_v17  ;;  %347 = vmatpush.bf16.msra.mxu3 %v1180_v17 }
  0x2f   :  { %329 = vmatpush.bf16.msra.mxu2 %v1184_v18 }
  0x30   :  { %268 = vmatpush.bf16.msra.mxu1 %v1211_v23 }
  0x32   :  { %205 = vmatpush.bf16.msra.mxu0 %v1187_v19  ;;  %348 = vmatpush.bf16.msra.mxu3 %v1187_v19 }
  0x33   :  { %330 = vmatpush.bf16.msra.mxu2 %v1206_v22 }
  0x34   :  { %269 = vmatpush.bf16.msra.mxu1 %v1217_v24 }
  0x35   :  { %206 = vmatmul.bf16.vlgmr.msra.gmra.mxu0 %v1072_v20 }
  0x36   :  { %357 = vmatpush.bf16.msrb.mxu0 %v1133_v3  ;;  %404 = vmatpush.bf16.msrb.mxu3 %v1133_v3 }
  0x37   :  { %388 = vmatpush.bf16.msrb.mxu2 %v1125_v0 }
  0x38   :  { %331 = vmatmul.bf16.vlgmr.msra.gmra.mxu2 %v1072_v20  ;;  %370 = vmatpush.bf16.msrb.mxu1 %v1130_v2 }
  0x3a   :  { %358 = vmatpush.bf16.msrb.mxu0 %v1139_v5  ;;  %405 = vmatpush.bf16.msrb.mxu3 %v1139_v5 }
  0x3b   :  { %389 = vmatpush.bf16.msrb.mxu2 %v1128_v1 }
  0x3c   :  { %371 = vmatpush.bf16.msrb.mxu1 %v1136_v4 }
  0x3e   :  { %359 = vmatpush.bf16.msrb.mxu0 %v1149_v8  ;;  %406 = vmatpush.bf16.msrb.mxu3 %v1149_v8 }
  0x3f   :  { %390 = vmatpush.bf16.msrb.mxu2 %v1142_v6 }
  0x40   :  { %372 = vmatpush.bf16.msrb.mxu1 %v1146_v7 }
  0x42   :  { %360 = vmatpush.bf16.msrb.mxu0 %v1159_v11  ;;  %407 = vmatpush.bf16.msrb.mxu3 %v1159_v11 }
  0x43   :  { %391 = vmatpush.bf16.msrb.mxu2 %v1152_v9 }
  0x44   :  { %373 = vmatpush.bf16.msrb.mxu1 %v1156_v10 }
  0x46   :  { %361 = vmatpush.bf16.msrb.mxu0 %v1169_v14  ;;  %408 = vmatpush.bf16.msrb.mxu3 %v1169_v14 }
  0x47   :  { %392 = vmatpush.bf16.msrb.mxu2 %v1162_v12 }
  0x48   :  { %374 = vmatpush.bf16.msrb.mxu1 %v1166_v13 }
  0x4a   :  { %362 = vmatpush.bf16.msrb.mxu0 %v1203_v21  ;;  %409 = vmatpush.bf16.msrb.mxu3 %v1203_v21 }
  0x4b   :  { %393 = vmatpush.bf16.msrb.mxu2 %v1172_v15 }
  0x4c   :  { %375 = vmatpush.bf16.msrb.mxu1 %v1176_v16 }
  0x4e   :  { %363 = vmatpush.bf16.msrb.mxu0 %v1211_v23  ;;  %410 = vmatpush.bf16.msrb.mxu3 %v1211_v23 }
  0x4f   :  { %394 = vmatpush.bf16.msrb.mxu2 %v1180_v17 }
  0x50   :  { %376 = vmatpush.bf16.msrb.mxu1 %v1184_v18 }
  0x52   :  { %364 = vmatpush.bf16.msrb.mxu0 %v1217_v24  ;;  %411 = vmatpush.bf16.msrb.mxu3 %v1217_v24 }
  0x53   :  { %395 = vmatpush.bf16.msrb.mxu2 %v1187_v19 }
  0x54   :  { %377 = vmatpush.bf16.msrb.mxu1 %v1206_v22 }
  0x56   :  { %417 = vmatpush.bf16.msra.mxu0 %v1130_v2 }
  0x57   :  { %455 = vmatpush.bf16.msra.mxu2 %v1133_v3 }
  0x5a   :  { %418 = vmatpush.bf16.msra.mxu0 %v1136_v4 }
  0x5b   :  { %456 = vmatpush.bf16.msra.mxu2 %v1139_v5 }
  0x5e   :  { %419 = vmatpush.bf16.msra.mxu0 %v1146_v7 }
  0x5f   :  { %457 = vmatpush.bf16.msra.mxu2 %v1149_v8 }
  0x62   :  { %420 = vmatpush.bf16.msra.mxu0 %v1156_v10 }
  0x63   :  { %458 = vmatpush.bf16.msra.mxu2 %v1159_v11 }
  0x66   :  { %421 = vmatpush.bf16.msra.mxu0 %v1166_v13 }
  0x67   :  { %459 = vmatpush.bf16.msra.mxu2 %v1169_v14 }
  0x6a   :  { %422 = vmatpush.bf16.msra.mxu0 %v1176_v16 }
  0x6b   :  { %460 = vmatpush.bf16.msra.mxu2 %v1203_v21 }
  0x6e   :  { %423 = vmatpush.bf16.msra.mxu0 %v1184_v18 }
  0x6f   :  { %461 = vmatpush.bf16.msra.mxu2 %v1211_v23 }
  0x72   :  { %424 = vmatpush.bf16.msra.mxu0 %v1206_v22 }
  0x73   :  { %462 = vmatpush.bf16.msra.mxu2 %v1217_v24 }
  0xb2   :  { %v207_v26 = vpop.f32.mrf.mxu0 }
  0xb3   :  { %v211_v27 = vadd.f32 %v207_v26, %v149_v25 }
  0xb5   :  { %890 = vtanh.f32 %v211_v27 }
  0xba   :  { %v209_v28 = vpop.f32.mrf.mxu0 }
  0xbb   :  { %v891_v29 = vpop.eup %890  ;;  %v332_v31 = vpop.f32.mrf.mxu2 }
  0xbc   :  { %v213_v30 = vpack.c.bf16 %v891_v29, %v891_v29 }
  0xbe   :  { %270 = vmatmul.bf16.vlgmr.msra.gmra.mxu1 %v213_v30  ;;  %349 = vmatmul.bf16.vlgmr.msra.gmra.mxu3 %v213_v30 }
  0xbf   :  { %439 = vmatpush.bf16.msra.mxu1 %v1125_v0  ;;  %468 = vmatpush.bf16.msra.mxu3 %v1130_v2 }
  0xc3   :  { %440 = vmatpush.bf16.msra.mxu1 %v1128_v1  ;;  %469 = vmatpush.bf16.msra.mxu3 %v1136_v4  ;;  %v334_v32 = vpop.f32.mrf.mxu2 }
  0xc7   :  { %441 = vmatpush.bf16.msra.mxu1 %v1142_v6  ;;  %470 = vmatpush.bf16.msra.mxu3 %v1146_v7 }
  0xcb   :  { %442 = vmatpush.bf16.msra.mxu1 %v1152_v9  ;;  %471 = vmatpush.bf16.msra.mxu3 %v1156_v10 }
  0xcf   :  { %443 = vmatpush.bf16.msra.mxu1 %v1162_v12  ;;  %472 = vmatpush.bf16.msra.mxu3 %v1166_v13 }
  0xd3   :  { %444 = vmatpush.bf16.msra.mxu1 %v1172_v15  ;;  %473 = vmatpush.bf16.msra.mxu3 %v1176_v16 }
  0xd7   :  { %445 = vmatpush.bf16.msra.mxu1 %v1180_v17  ;;  %474 = vmatpush.bf16.msra.mxu3 %v1184_v18 }
  0xdb   :  { %446 = vmatpush.bf16.msra.mxu1 %v1187_v19  ;;  %475 = vmatpush.bf16.msra.mxu3 %v1206_v22 }
 0x13b   :  { %v271_v34 = vpop.f32.mrf.mxu1 }
 0x13c   :  { %v333_v35 = vadd.f32 %v332_v31, %v271_v34 }
 0x13e   :  { %v336_v36 = vadd.f32 %v889_v33, %v333_v35  ;;  %v438_v35 = vld [vmem:[#allocation4 + $0x18] sm:$0xff] }
 0x140   :  { %892 = vtanh.f32 %v336_v36 }
 0x141   :  { %v350_v38 = vpop.f32.mrf.mxu3 }
 0x142   :  { %v354_v39 = vadd.f32 %v350_v38, %v340_v37 }
 0x143   :  { %v273_v40 = vpop.f32.mrf.mxu1 }
 0x144   :  { %894 = vtanh.f32 %v354_v39 }
 0x146   :  { %v893_v41 = vpop.eup %892 }
 0x147   :  { %v338_v42 = vpack.c.bf16 %v893_v41, %v893_v41  ;;  %v680_v56 = vrot.slane %v893_v41, 7 }
 0x149   :  { %v352_v43 = vpop.f32.mrf.mxu3  ;;  %378 = vmatmul.bf16.vlgmr.msrb.gmra.mxu1 %v338_v42 }
 0x14a   :  { %v895_v44 = vpop.eup %894  ;;  %503 = vmatpush.bf16.msrb.mxu1 %v1133_v3 }
 0x14b   :  { %718 = vst [vmem:[#allocation13] sm:$0xff] %v895_v44  ;;  %v356_v45 = vpack.c.bf16 %v895_v44, %v895_v44 }
 0x14d   :  { %365 = vmatmul.bf16.vlgmr.msrb.gmra.mxu0 %v356_v45  ;;  %396 = vmatmul.bf16.vlgmr.msrb.gmra.mxu2 %v356_v45 }
 0x14e   :  { %487 = vmatpush.bf16.msrb.mxu0 %v1125_v0  ;;  %516 = vmatpush.bf16.msrb.mxu2 %v1130_v2 }
 0x14f   :  { %504 = vmatpush.bf16.msrb.mxu1 %v1139_v5 }
 0x152   :  { %488 = vmatpush.bf16.msrb.mxu0 %v1128_v1  ;;  %517 = vmatpush.bf16.msrb.mxu2 %v1136_v4 }
 0x153   :  { %505 = vmatpush.bf16.msrb.mxu1 %v1149_v8 }
 0x156   :  { %489 = vmatpush.bf16.msrb.mxu0 %v1142_v6  ;;  %518 = vmatpush.bf16.msrb.mxu2 %v1146_v7 }
 0x157   :  { %506 = vmatpush.bf16.msrb.mxu1 %v1159_v11 }
 0x15a   :  { %490 = vmatpush.bf16.msrb.mxu0 %v1152_v9  ;;  %519 = vmatpush.bf16.msrb.mxu2 %v1156_v10 }
 0x15b   :  { %507 = vmatpush.bf16.msrb.mxu1 %v1169_v14 }
 0x15e   :  { %491 = vmatpush.bf16.msrb.mxu0 %v1162_v12  ;;  %520 = vmatpush.bf16.msrb.mxu2 %v1166_v13 }
 0x15f   :  { %508 = vmatpush.bf16.msrb.mxu1 %v1203_v21 }
 0x162   :  { %492 = vmatpush.bf16.msrb.mxu0 %v1172_v15  ;;  %521 = vmatpush.bf16.msrb.mxu2 %v1176_v16 }
 0x163   :  { %509 = vmatpush.bf16.msrb.mxu1 %v1211_v23 }
 0x166   :  { %493 = vmatpush.bf16.msrb.mxu0 %v1180_v17  ;;  %522 = vmatpush.bf16.msrb.mxu2 %v1184_v18 }
 0x167   :  { %510 = vmatpush.bf16.msrb.mxu1 %v1217_v24 }
 0x16a   :  { %494 = vmatpush.bf16.msrb.mxu0 %v1187_v19  ;;  %523 = vmatpush.bf16.msrb.mxu2 %v1206_v22 }
 0x1c6   :  { %v379_v46 = vpop.f32.mrf.mxu1 }
 0x1ca   :  { %v366_v47 = vpop.f32.mrf.mxu0 }
 0x1cb   :  { %v380_v48 = vadd.f32 %v379_v46, %v366_v47  ;;  %v486_v46 = vld [vmem:[#allocation4 + $0x20] sm:$0xff] }
 0x1cd   :  { %v383_v49 = vadd.f32 %v889_v33, %v380_v48 }
 0x1ce   :  { %v381_v50 = vpop.f32.mrf.mxu1 }
 0x1cf   :  { %896 = vtanh.f32 %v383_v49 }
 0x1d0   :  { %v397_v52 = vpop.f32.mrf.mxu2 }
 0x1d1   :  { %v401_v53 = vadd.f32 %v397_v52, %v387_v51  ;;  %v630_v52 = vld [vmem:[#allocation4 + $0x38] sm:$0xff] }
 0x1d2   :  { %v368_v54 = vpop.f32.mrf.mxu0 }
 0x1d3   :  { %898 = vtanh.f32 %v401_v53 }
 0x1d5   :  { %v897_v55 = vpop.eup %896 }
 0x1d6   :  { %720 = vst [vmem:[#allocation13 + $0x8] sm:$0xff] %v897_v55  ;;  %v1296_v57 = vpack.c.bf16 %v897_v55, %v897_v55  ;;  %v683_v58 = vrot.slane %v897_v55, 6  ;;  %v686_v59 = vrot.slane %v897_v55, 5  ;;  %v689_v61 = vrot.slane %v897_v55, 4 }
 0x1d7   :  { %v692_v20 = vrot.slane %v897_v55, 3  ;;  %v695_v27 = vrot.slane %v897_v55, 2  ;;  %v698_v29 = vrot.slane %v897_v55, 1  ;;  %744 = dma.vmem_to_hbm [thread:$0]  %s737_s24, 256, %s739_s27, [#allocation14], %s1068_s9, %s1068_s9, %s1069_s10  }
 0x1d8   :  { %v399_v60 = vpop.f32.mrf.mxu2  ;;  %425 = vmatmul.bf16.vlgmr.msra.gmra.mxu0 %v1296_v57  ;;  %v701_v62 = vsel %vm700_vm0, %v680_v56, %v683_v58 }
 0x1d9   :  { %v899_v63 = vpop.eup %898  ;;  %551 = vmatpush.bf16.msra.mxu0 %v1133_v3  ;;  %v703_v25 = vsel %vm702_vm1, %v701_v62, %v686_v59 }
 0x1da   :  { %v403_v26 = vpack.c.bf16 %v899_v63, %v899_v63  ;;  %v705_v28 = vsel %vm704_vm2, %v703_v25, %v689_v61 }
 0x1db   :  { %v707_v30 = vsel %vm706_vm3, %v705_v28, %v692_v20 }
 0x1dc   :  { %412 = vmatmul.bf16.vlgmr.msrb.gmra.mxu3 %v403_v26  ;;  %447 = vmatmul.bf16.vlgmr.msra.gmra.mxu1 %v403_v26  ;;  %v709_v31 = vsel %vm708_vm4, %v707_v30, %v695_v27 }
 0x1dd   :  { %535 = vmatpush.bf16.msrb.mxu3 %v1125_v0  ;;  %564 = vmatpush.bf16.msra.mxu1 %v1130_v2  ;;  %v711_v32 = vsel %vm710_vm5, %v709_v31, %v698_v29 }
 0x1de   :  { %552 = vmatpush.bf16.msra.mxu0 %v1139_v5  ;;  %v713_v33 = vsel %vm712_vm6, %v711_v32, %v897_v55 }
 0x1df   :  { %714 = vst [vmem:[#allocation12] sm:$0xff] %v713_v33 }
 0x1e0   :  { %731 = dma.vmem_to_hbm [thread:$0]  %s727_s19, 128, %s729_s22, [#allocation6]  }
 0x1e1   :  { %536 = vmatpush.bf16.msrb.mxu3 %v1128_v1  ;;  %565 = vmatpush.bf16.msra.mxu1 %v1136_v4 }
 0x1e2   :  { %553 = vmatpush.bf16.msra.mxu0 %v1149_v8 }
 0x1e5   :  { %537 = vmatpush.bf16.msrb.mxu3 %v1142_v6  ;;  %566 = vmatpush.bf16.msra.mxu1 %v1146_v7 }
 0x1e6   :  { %554 = vmatpush.bf16.msra.mxu0 %v1159_v11 }
 0x1e9   :  { %538 = vmatpush.bf16.msrb.mxu3 %v1152_v9  ;;  %567 = vmatpush.bf16.msra.mxu1 %v1156_v10 }
 0x1ea   :  { %555 = vmatpush.bf16.msra.mxu0 %v1169_v14 }
 0x1ec   :  { %476 = vmatmul.bf16.vlgmr.msra.gmra.mxu3 %v1296_v57 }
 0x1ed   :  { %539 = vmatpush.bf16.msrb.mxu3 %v1162_v12  ;;  %568 = vmatpush.bf16.msra.mxu1 %v1166_v13 }
 0x1ee   :  { %556 = vmatpush.bf16.msra.mxu0 %v1203_v21 }
 0x1f1   :  { %540 = vmatpush.bf16.msrb.mxu3 %v1172_v15  ;;  %569 = vmatpush.bf16.msra.mxu1 %v1176_v16 }
 0x1f2   :  { %557 = vmatpush.bf16.msra.mxu0 %v1211_v23 }
 0x1f5   :  { %541 = vmatpush.bf16.msrb.mxu3 %v1180_v17  ;;  %570 = vmatpush.bf16.msra.mxu1 %v1184_v18 }
 0x1f6   :  { %558 = vmatpush.bf16.msra.mxu0 %v1217_v24 }
 0x1f9   :  { %542 = vmatpush.bf16.msrb.mxu3 %v1187_v19  ;;  %571 = vmatpush.bf16.msra.mxu1 %v1206_v22 }
 0x1fd   :  { %599 = vmatpush.bf16.msra.mxu3 %v1133_v3 }
 0x201   :  { %600 = vmatpush.bf16.msra.mxu3 %v1139_v5 }
 0x205   :  { %601 = vmatpush.bf16.msra.mxu3 %v1149_v8 }
 0x209   :  { %602 = vmatpush.bf16.msra.mxu3 %v1159_v11 }
 0x20d   :  { %603 = vmatpush.bf16.msra.mxu3 %v1169_v14 }
 0x211   :  { %604 = vmatpush.bf16.msra.mxu3 %v1203_v21 }
 0x215   :  { %605 = vmatpush.bf16.msra.mxu3 %v1211_v23 }
 0x219   :  { %606 = vmatpush.bf16.msra.mxu3 %v1217_v24 }
 0x255   :  { %v426_v34 = vpop.f32.mrf.mxu0 }
 0x259   :  { %v448_v36 = vpop.f32.mrf.mxu1 }
 0x25a   :  { %v452_v37 = vadd.f32 %v448_v36, %v438_v35 }
 0x25c   :  { %900 = vtanh.f32 %v452_v37 }
 0x25d   :  { %v428_v38 = vpop.f32.mrf.mxu0 }
 0x25f   :  { %v413_v39 = vpop.f32.mrf.mxu3 }
 0x261   :  { %v450_v40 = vpop.f32.mrf.mxu1 }
 0x262   :  { %v901_v41 = vpop.eup %900 }
 0x263   :  { %v454_v42 = vpack.c.bf16 %v901_v41, %v901_v41 }
 0x265   :  { %463 = vmatmul.bf16.vlgmr.msra.gmra.mxu2 %v454_v42  ;;  %495 = vmatmul.bf16.vlgmr.msrb.gmra.mxu0 %v454_v42 }
 0x266   :  { %583 = vmatpush.bf16.msra.mxu2 %v1125_v0  ;;  %612 = vmatpush.bf16.msrb.mxu0 %v1130_v2 }
 0x267   :  { %v415_v43 = vpop.f32.mrf.mxu3 }
 0x26a   :  { %584 = vmatpush.bf16.msra.mxu2 %v1128_v1  ;;  %613 = vmatpush.bf16.msrb.mxu0 %v1136_v4 }
 0x26e   :  { %585 = vmatpush.bf16.msra.mxu2 %v1142_v6  ;;  %614 = vmatpush.bf16.msrb.mxu0 %v1146_v7 }
 0x26f   :  { %v477_v44 = vpop.f32.mrf.mxu3 }
 0x272   :  { %586 = vmatpush.bf16.msra.mxu2 %v1152_v9  ;;  %615 = vmatpush.bf16.msrb.mxu0 %v1156_v10 }
 0x275   :  { %524 = vmatmul.bf16.vlgmr.msrb.gmra.mxu2 %v1296_v57 }
 0x276   :  { %587 = vmatpush.bf16.msra.mxu2 %v1162_v12  ;;  %616 = vmatpush.bf16.msrb.mxu0 %v1166_v13 }
 0x277   :  { %v479_v45 = vpop.f32.mrf.mxu3 }
 0x27a   :  { %588 = vmatpush.bf16.msra.mxu2 %v1172_v15  ;;  %617 = vmatpush.bf16.msrb.mxu0 %v1176_v16 }
 0x27e   :  { %589 = vmatpush.bf16.msra.mxu2 %v1180_v17  ;;  %618 = vmatpush.bf16.msrb.mxu0 %v1184_v18 }
 0x282   :  { %590 = vmatpush.bf16.msra.mxu2 %v1187_v19  ;;  %619 = vmatpush.bf16.msrb.mxu0 %v1206_v22 }
 0x286   :  { %647 = vmatpush.bf16.msrb.mxu2 %v1133_v3 }
 0x28a   :  { %648 = vmatpush.bf16.msrb.mxu2 %v1139_v5 }
 0x28e   :  { %649 = vmatpush.bf16.msrb.mxu2 %v1149_v8 }
 0x292   :  { %650 = vmatpush.bf16.msrb.mxu2 %v1159_v11 }
 0x296   :  { %651 = vmatpush.bf16.msrb.mxu2 %v1169_v14 }
 0x29a   :  { %652 = vmatpush.bf16.msrb.mxu2 %v1203_v21 }
 0x29e   :  { %653 = vmatpush.bf16.msrb.mxu2 %v1211_v23 }
 0x2a2   :  { %654 = vmatpush.bf16.msrb.mxu2 %v1217_v24 }
 0x2e2   :  { %v496_v47 = vpop.f32.mrf.mxu0 }
 0x2e3   :  { %v500_v48 = vadd.f32 %v496_v47, %v486_v46 }
 0x2e5   :  { %902 = vtanh.f32 %v500_v48 }
 0x2e8   :  { %v464_v49 = vpop.f32.mrf.mxu2 }
 0x2ea   :  { %v498_v3 = vpop.f32.mrf.mxu0 }
 0x2eb   :  { %v903_v50 = vpop.eup %902 }
 0x2ec   :  { %v502_v5 = vpack.c.bf16 %v903_v50, %v903_v50 }
 0x2ee   :  { %511 = vmatmul.bf16.vlgmr.msrb.gmra.mxu1 %v502_v5  ;;  %543 = vmatmul.bf16.vlgmr.msrb.gmra.mxu3 %v502_v5 }
 0x2ef   :  { %631 = vmatpush.bf16.msrb.mxu1 %v1125_v0  ;;  %660 = vmatpush.bf16.msrb.mxu3 %v1130_v2  ;;  %v534_v2 = vld [vmem:[#allocation4 + $0x28] sm:$0xff] }
 0x2f0   :  { %v466_v8 = vpop.f32.mrf.mxu2 }
 0x2f3   :  { %632 = vmatpush.bf16.msrb.mxu1 %v1128_v1  ;;  %661 = vmatpush.bf16.msrb.mxu3 %v1136_v4 }
 0x2f7   :  { %633 = vmatpush.bf16.msrb.mxu1 %v1142_v6  ;;  %662 = vmatpush.bf16.msrb.mxu3 %v1146_v7 }
 0x2f8   :  { %v525_v11 = vpop.f32.mrf.mxu2 }
 0x2fb   :  { %634 = vmatpush.bf16.msrb.mxu1 %v1152_v9  ;;  %663 = vmatpush.bf16.msrb.mxu3 %v1156_v10 }
 0x2fe   :  { %572 = vmatmul.bf16.vlgmr.msra.gmra.mxu1 %v1296_v57 }
 0x2ff   :  { %635 = vmatpush.bf16.msrb.mxu1 %v1162_v12  ;;  %664 = vmatpush.bf16.msrb.mxu3 %v1166_v13 }
 0x300   :  { %v527_v0 = vpop.f32.mrf.mxu2 }
 0x303   :  { %636 = vmatpush.bf16.msrb.mxu1 %v1172_v15  ;;  %665 = vmatpush.bf16.msrb.mxu3 %v1176_v16  ;;  %v582_v16 = vld [vmem:[#allocation4 + $0x30] sm:$0xff] }
 0x307   :  { %637 = vmatpush.bf16.msrb.mxu1 %v1180_v17  ;;  %666 = vmatpush.bf16.msrb.mxu3 %v1184_v18 }
 0x30b   :  { %638 = vmatpush.bf16.msrb.mxu1 %v1187_v19  ;;  %667 = vmatpush.bf16.msrb.mxu3 %v1206_v22 }
 0x36b   :  { %v512_v1 = vpop.f32.mrf.mxu1 }
 0x371   :  { %v544_v4 = vpop.f32.mrf.mxu3 }
 0x372   :  { %v548_v6 = vadd.f32 %v544_v4, %v534_v2 }
 0x373   :  { %v514_v7 = vpop.f32.mrf.mxu1 }
 0x374   :  { %904 = vtanh.f32 %v548_v6 }
 0x379   :  { %v546_v9 = vpop.f32.mrf.mxu3 }
 0x37a   :  { %v905_v10 = vpop.eup %904 }
 0x37b   :  { %v550_v12 = vpack.c.bf16 %v905_v10, %v905_v10  ;;  %v573_v13 = vpop.f32.mrf.mxu1 }
 0x37d   :  { %559 = vmatmul.bf16.vlgmr.msra.gmra.mxu0 %v550_v12  ;;  %591 = vmatmul.bf16.vlgmr.msra.gmra.mxu2 %v550_v12 }
 0x383   :  { %v575_v14 = vpop.f32.mrf.mxu1 }
 0x38d   :  { %620 = vmatmul.bf16.vlgmr.msrb.gmra.mxu0 %v1296_v57 }
 0x3fa   :  { %v560_v15 = vpop.f32.mrf.mxu0 }
 0x400   :  { %v592_v17 = vpop.f32.mrf.mxu2 }
 0x401   :  { %v596_v18 = vadd.f32 %v592_v17, %v582_v16 }
 0x402   :  { %v562_v19 = vpop.f32.mrf.mxu0 }
 0x403   :  { %906 = vtanh.f32 %v596_v18 }
 0x408   :  { %v594_v21 = vpop.f32.mrf.mxu2 }
 0x409   :  { %v907_v22 = vpop.eup %906 }
 0x40a   :  { %v598_v23 = vpack.c.bf16 %v907_v22, %v907_v22  ;;  %v621_v24 = vpop.f32.mrf.mxu0 }
 0x40c   :  { %607 = vmatmul.bf16.vlgmr.msra.gmra.mxu3 %v598_v23  ;;  %639 = vmatmul.bf16.vlgmr.msrb.gmra.mxu1 %v598_v23 }
 0x412   :  { %v623_v51 = vpop.f32.mrf.mxu0 }
 0x41c   :  { %668 = vmatmul.bf16.vlgmr.msrb.gmra.mxu3 %v1296_v57 }
 0x489   :  { %v640_v53 = vpop.f32.mrf.mxu1 }
 0x48a   :  { %v644_v54 = vadd.f32 %v640_v53, %v630_v52 }
 0x48c   :  { %908 = vtanh.f32 %v644_v54 }
 0x48f   :  { %v608_v55 = vpop.f32.mrf.mxu3 }
 0x491   :  { %v642_v56 = vpop.f32.mrf.mxu1 }
 0x492   :  { %v909_v58 = vpop.eup %908 }
 0x493   :  { %v646_v59 = vpack.c.bf16 %v909_v58, %v909_v58 }
 0x495   :  { %655 = vmatmul.bf16.vlgmr.msrb.gmra.mxu2 %v646_v59 }
 0x497   :  { %v610_v60 = vpop.f32.mrf.mxu3 }
 0x49f   :  { %v669_v61 = vpop.f32.mrf.mxu3 }
 0x4a7   :  { %v671_v57 = vpop.f32.mrf.mxu3 }
 0x518   :  { %v656_v62 = vpop.f32.mrf.mxu2 }
 0x520   :  { %v658_v63 = vpop.f32.mrf.mxu2 }
 0x521   :  { %1060 = dma.done.wait [#allocation6], 128  }
 0x522   :  { %1061 = vsyncadd [#allocation6], 4294967168 }
 0x523   :  { %1062 = dma.done.wait [#allocation14], 256  }
 0x524   :  { %1063 = vsyncadd [#allocation14], 4294967040 }
 0x525   :  { %753 = vsyncpa [#allocation5], 1 }
 0x526   :  { %754 = vsyncpa [#allocation8], 1 }
 0x527   :  { %755 = vsyncpa [#allocation11], 1 }
 0x528   :  { %756 = vsyncpa [#allocation6], 1 }
 0x529   :  { %757 = vsyncpa [#allocation14], 1 }

</bundles_post_ra>
